<compile_context>
chip_gen: v7x
topology: tpu7x:2x2x1
jax: 0.10.0
libtpu: 0.0.40
codegen_flags: <defaults>
</compile_context>

<pallas_src>
import functools

import jax
import jax.numpy as jnp
from jax.experimental import pallas as pl
from jax.experimental.pallas import tpu as pltpu

IGNORE_LABEL = -1
# TODO(synk): configer-driven values (ce_ignore_index, loss weights, loss_core,
# ce_weight, use_rmi) are hard-coded with typical ProtoSeg settings.
LOSS_PPL_A_WEIGHT = 0.01
LOSS_PPL_B_WEIGHT = 0.001
LOSS_BPC_WEIGHT = 0.01
LOSS_BPD_WEIGHT = 0.001


def _round_up(x, m):
    return ((x + m - 1) // m) * m


def _interp_matrix(out_size, in_size):
    """Row-stochastic bilinear interpolation matrix, align_corners=True."""
    if out_size == 1:
        src = jnp.zeros((1,), jnp.float32)
    else:
        src = jnp.arange(out_size, dtype=jnp.float32) * (in_size - 1) / (out_size - 1)
    i0 = jnp.clip(jnp.floor(src).astype(jnp.int32), 0, in_size - 1)
    i1 = jnp.clip(i0 + 1, 0, in_size - 1)
    frac = src - i0.astype(jnp.float32)
    cols = jnp.arange(in_size, dtype=jnp.int32)
    w0 = (1.0 - frac)[:, None] * (cols[None, :] == i0[:, None]).astype(jnp.float32)
    w1 = frac[:, None] * (cols[None, :] == i1[:, None]).astype(jnp.float32)
    return w0 + w1  # (out_size, in_size)


# --------------------------------------------------------------------------- #
# Kernel 1: bilinear-upsampled pixel CE with ignore_index, row-tiled partials. #
# --------------------------------------------------------------------------- #
def _seg_ce_kernel(seg_ref, wh_ref, wwt_ref, tgt_ref, out_ref, *, n_cls, ws, h_full):
    # seg_ref : (1, Hs, C*Ws)  native dtype  one batch item of low-res logits
    # wh_ref  : (TH, Hs)       f32           row tile of height interp matrix
    # wwt_ref : (Ws, W)        f32           width interp matrix (pre-transposed)
    # tgt_ref : (1, TH, W)     int32
    # out_ref : (1, 1, 128)    f32   lane0 = sum of per-pixel CE, lane1 = valid count
    r = pl.program_id(1)
    wh = wh_ref[...]
    wwt = wwt_ref[...]
    seg2 = seg_ref[0].astype(jnp.float32)                   # (Hs, C*Ws)
    tgt = tgt_ref[0]                                         # (TH, W)
    th, w = tgt.shape

    # One lane-dense MXU matmul does the height interpolation for all classes.
    t_all = jnp.dot(wh, seg2, preferred_element_type=jnp.float32)   # (TH, C*Ws)

    # Online softmax over classes; only (TH, W) planes are live at any time.
    m = jnp.full((th, w), -1e30, jnp.float32)
    s = jnp.zeros((th, w), jnp.float32)
    sel = jnp.zeros((th, w), jnp.float32)
    # TODO(synk): for very large class counts (e.g. 150-class ADE20K) switch to
    # lax.fori_loop(unroll=4..8) with dynamic lane slices to bound code size.
    for ci in range(n_cls):
        t = t_all[:, ci * ws:(ci + 1) * ws]                           # (TH, Ws)
        lc = jnp.dot(t, wwt, preferred_element_type=jnp.float32)      # (TH, W)
        m_new = jnp.maximum(m, lc)
        s = s * jnp.exp(m - m_new) + jnp.exp(lc - m_new)
        sel = jnp.where(tgt == ci, lc, sel)
        m = m_new

    # Mask ignore pixels and the ragged tail of the last row tile.
    row = r * th + jax.lax.broadcasted_iota(jnp.int32, (th, w), 0)
    valid = (tgt != IGNORE_LABEL) & (row < h_full)
    ce = jnp.log(s) + m - sel                     # logsumexp - selected logit
    loss_sum = jnp.sum(jnp.where(valid, ce, 0.0))
    cnt = jnp.sum(valid.astype(jnp.float32))

    lane = jax.lax.broadcasted_iota(jnp.int32, (1, 1, 128), 2)
    out_ref[...] = (jnp.where(lane == 0, loss_sum, 0.0)
                    + jnp.where(lane == 1, cnt, 0.0))


def _seg_ce_loss(seg, target):
    """mean_{valid pixels} CE(bilinear_upsample(seg), target), ignore_index=-1."""
    n, c, hs, ws = seg.shape
    h, w = int(target.shape[1]), int(target.shape[2])

    # Row tile sized so ~(C*Ws + 6*W) f32 live rows stay around ~6 MB of VMEM
    # (fits v5e/v6e/v7x default scoped budgets without an explicit limit).
    per_row_bytes = 4 * (c * ws + 6 * w)
    th = min(512, max(8, (6 * 1024 * 1024 // per_row_bytes) // 8 * 8))
    if th >= h:
        th = h                                    # full-extent block is always legal
    gr = pl.cdiv(h, th)

    wh = _interp_matrix(h, hs)                    # (H, Hs)
    wwt = _interp_matrix(w, ws).T                 # (Ws, W)
    # Re-lay-out the tiny low-res seg once: (N, C, Hs, Ws) -> (N, Hs, C*Ws) so the
    # height-interp matmul is a single lane-dense MXU op over all classes.
    seg2 = jnp.transpose(seg, (0, 2, 1, 3)).reshape(n, hs, c * ws)
    tgt = target.astype(jnp.int32)

    kernel = functools.partial(_seg_ce_kernel, n_cls=c, ws=ws, h_full=h)
    sums = pl.pallas_call(
        kernel,
        grid=(n, gr),
        out_shape=jax.ShapeDtypeStruct((n * gr, 1, 128), jnp.float32),
        in_specs=[
            pl.BlockSpec((1, hs, c * ws), lambda b, r: (b, 0, 0)),
            pl.BlockSpec((th, hs), lambda b, r: (r, 0)),
            pl.BlockSpec((ws, w), lambda b, r: (0, 0)),
            pl.BlockSpec((1, th, w), lambda b, r: (b, r, 0)),
        ],
        out_specs=pl.BlockSpec((1, 1, 128), lambda b, r: (b * gr + r, 0, 0)),
        compiler_params=pltpu.CompilerParams(
            dimension_semantics=("parallel", "parallel")),
    )(seg2, wh, wwt, tgt)

    loss_sum = jnp.sum(sums[:, 0, 0])
    cnt = jnp.sum(sums[:, 0, 1])
    # Guard against an all-ignored batch (torch would yield NaN here).
    return loss_sum / jnp.maximum(cnt, 1.0)


# --------------------------------------------------------------------------- #
# Kernel 2: row-wise CE + (1 - selected)^2 over valid rows (PPL_a/PPL_b, BPC/BPD)
# --------------------------------------------------------------------------- #
def _proto_kernel(cl_ref, ct_ref, out_ref, *, m_rows):
    # cl_ref  : (TM, P)     native dtype  logits in original (rows, protos) layout
    # ct_ref  : (TM, 1)     int32         targets as a column
    # out_ref : (1, 1, 128) f32   lane0 = sum CE, lane1 = sum (1-sel)^2, lane2 = count
    i = pl.program_id(0)
    cl = cl_ref[...].astype(jnp.float32)
    ct = ct_ref[...]
    tm, p = cl.shape

    # Valid mask: not ignore_label AND inside the real row range (ragged tail of
    # the last block is garbage data; mask instead of padding the huge array).
    row = i * tm + jax.lax.broadcasted_iota(jnp.int32, (tm, 1), 0)
    valid = (ct != IGNORE_LABEL) & (row < m_rows)                    # (TM, 1)

    lane_cls = jax.lax.broadcasted_iota(jnp.int32, (tm, p), 1)
    onehot = lane_cls == ct                                          # (TM, P)

    m = jnp.max(cl, axis=1, keepdims=True)                           # (TM, 1)
    z = cl - m                                                       # reused for lse & sel
    lse = jnp.log(jnp.sum(jnp.exp(z), axis=1, keepdims=True))
    zsel = jnp.sum(jnp.where(onehot, z, 0.0), axis=1, keepdims=True)
    sel = zsel + m                                                   # original selected logit

    # where(), not multiply-by-mask: tail garbage may be NaN/Inf.
    ppc_sum = jnp.sum(jnp.where(valid, lse - zsel, 0.0))             # CE = (lse+m)-(zsel+m)
    ppd_sum = jnp.sum(jnp.where(valid, (1.0 - sel) * (1.0 - sel), 0.0))
    cnt = jnp.sum(valid.astype(jnp.float32))

    lane = jax.lax.broadcasted_iota(jnp.int32, (1, 1, 128), 2)
    out_ref[...] = (jnp.where(lane == 0, ppc_sum, 0.0)
                    + jnp.where(lane == 1, ppd_sum, 0.0)
                    + jnp.where(lane == 2, cnt, 0.0))


def _proto_ce_dist_loss(logits, target):
    """Returns (mean CE over valid rows, mean (1-sel)^2 over valid rows)."""
    m_rows, p = logits.shape

    # ~10 MB of double-buffered logits per step keeps us inside every
    # generation's default scoped-VMEM budget while amortizing per-step overhead.
    budget = 10 * 1024 * 1024
    tm = max(8, min(8192, (budget // (2 * 4 * p)) // 8 * 8))
    if tm >= m_rows:
        tm = m_rows                                 # full-extent block is always legal
    g = pl.cdiv(m_rows, tm)

    ct = target.astype(jnp.int32).reshape(m_rows, 1)   # tiny array; logits untouched

    kernel = functools.partial(_proto_kernel, m_rows=m_rows)
    sums = pl.pallas_call(
        kernel,
        grid=(g,),
        out_shape=jax.ShapeDtypeStruct((g, 1, 128), jnp.float32),
        in_specs=[
            pl.BlockSpec((tm, p), lambda i: (i, 0)),
            pl.BlockSpec((tm, 1), lambda i: (i, 0)),
        ],
        out_specs=pl.BlockSpec((1, 1, 128), lambda i: (i, 0, 0)),
        compiler_params=pltpu.CompilerParams(dimension_semantics=("parallel",)),
    )(logits, ct)

    cnt = jnp.maximum(jnp.sum(sums[:, 0, 2]), 1.0)      # NaN guard (all-ignored)
    return jnp.sum(sums[:, 0, 0]) / cnt, jnp.sum(sums[:, 0, 1]) / cnt


# --------------------------------------------------------------------------- #
# Forward wrapper equivalent to PixelPrototypeCELoss_Ultra_V3.forward (dict preds)
# --------------------------------------------------------------------------- #
def pixel_prototype_ce_loss(preds, target):
    seg = preds["seg"]
    contrast_logits = preds["logits"]
    contrast_target = preds["target"]
    boundary_logits = preds["boundary_logits"]
    boundary_target = preds["boundary_target"]
    boundary_seg = preds["boundary_seg"]
    boundary_gt = preds["boundary_gt"]

    loss_seg = _seg_ce_loss(seg, target)
    boundary_loss = _seg_ce_loss(boundary_seg, boundary_gt[:, 0, :, :])
    loss_ppc, loss_ppd = _proto_ce_dist_loss(contrast_logits, contrast_target)
    loss_bpc, loss_bpd = _proto_ce_dist_loss(boundary_logits, boundary_target)

    prototype_loss = LOSS_PPL_A_WEIGHT * loss_ppc + LOSS_PPL_B_WEIGHT * loss_ppd
    boundary_prototype_loss = LOSS_BPC_WEIGHT * loss_bpc + LOSS_BPD_WEIGHT * loss_bpd
    return loss_seg + prototype_loss + boundary_prototype_loss + boundary_loss


if __name__ == "__main__":
    key = jax.random.PRNGKey(0)
    ks = jax.random.split(key, 10)

    N, C, HS, WS, H, W = 2, 4, 8, 8, 16, 16
    NUM_PROTO = 2
    P = C * NUM_PROTO            # prototypes per class * classes
    M = N * H * W
    CB = 2                        # boundary seg classes
    PB = CB * NUM_PROTO
    MB = 300                      # boundary prototype rows (exercises ragged tail)

    seg = jax.random.normal(ks[0], (N, C, HS, WS), jnp.float32)            # preds['seg']
    target = jax.random.randint(ks[1], (N, H, W), 0, C)
    target = jnp.where(jax.random.uniform(ks[2], (N, H, W)) < 0.1,
                       IGNORE_LABEL, target).astype(jnp.int32)

    contrast_logits = jax.random.normal(ks[3], (M, P), jnp.float32)        # preds['logits']
    contrast_target = jax.random.randint(ks[4], (M,), -1, P).astype(jnp.int32)

    boundary_logits = jax.random.normal(ks[5], (MB, PB), jnp.float32)      # preds['boundary_logits']
    boundary_target = jax.random.randint(ks[6], (MB,), -1, PB).astype(jnp.int32)

    boundary_seg = jax.random.normal(ks[7], (N, CB, HS, WS), jnp.float32)  # preds['boundary_seg']
    boundary_gt = jax.random.randint(ks[8], (N, 1, H, W), 0, CB)
    boundary_gt = jnp.where(jax.random.uniform(ks[9], (N, 1, H, W)) < 0.1,
                            IGNORE_LABEL, boundary_gt).astype(jnp.int32)   # preds['boundary_gt']

    preds = dict(seg=seg, logits=contrast_logits, target=contrast_target,
                 boundary_logits=boundary_logits, boundary_target=boundary_target,
                 boundary_seg=boundary_seg, boundary_gt=boundary_gt)

    loss = pixel_prototype_ce_loss(preds, target)
    jax.block_until_ready(loss)
    print("KERNEL_OK")
</pallas_src>

<mosaic_0001>
module attributes {stable_mosaic.version = 11 : i64} {
  func.func @_seg_ce_kernel(%arg0: i32, %arg1: i32, %arg2: memref<1x8x32xf32, #tpu.memory_space<vmem>>, %arg3: memref<16x8xf32, #tpu.memory_space<vmem>>, %arg4: memref<8x16xf32, #tpu.memory_space<vmem>>, %arg5: memref<1x16x16xi32, #tpu.memory_space<vmem>>, %arg6: memref<1x1x128xf32, #tpu.memory_space<vmem>>) attributes {dimension_semantics = [#tpu.dimension_semantics<parallel>, #tpu.dimension_semantics<parallel>], iteration_bounds = array<i64: 2, 1>, scalar_prefetch = 0 : i64, scratch_operands = 0 : i64, tpu.core_type = #tpu.core_type<tc>, window_params = [{transform_indices = @transform_0, window_bounds = array<i64: 1, 8, 32>}, {transform_indices = @transform_1, window_bounds = array<i64: 16, 8>}, {pipeline_mode = #tpu.pipeline_mode<synchronous>, transform_indices = @transform_2, window_bounds = array<i64: 8, 16>}, {transform_indices = @transform_3, window_bounds = array<i64: 1, 16, 16>}, {transform_indices = @transform_4, window_bounds = array<i64: 1, 1, 128>}]} {
    %c0 = arith.constant 0 : index
    %c0_0 = arith.constant 0 : index
    %0 = vector.load %arg3[%c0, %c0_0] : memref<16x8xf32, #tpu.memory_space<vmem>>, vector<16x8xf32>
    %c0_1 = arith.constant 0 : index
    %c0_2 = arith.constant 0 : index
    %1 = vector.load %arg4[%c0_1, %c0_2] : memref<8x16xf32, #tpu.memory_space<vmem>>, vector<8x16xf32>
    %c0_3 = arith.constant 0 : index
    %c0_4 = arith.constant 0 : index
    %c0_5 = arith.constant 0 : index
    %2 = vector.load %arg2[%c0_3, %c0_4, %c0_5] : memref<1x8x32xf32, #tpu.memory_space<vmem>>, vector<1x8x32xf32>
    %3 = vector.shape_cast %2 : vector<1x8x32xf32> to vector<8x32xf32>
    %c0_6 = arith.constant 0 : index
    %c0_7 = arith.constant 0 : index
    %c0_8 = arith.constant 0 : index
    %4 = vector.load %arg5[%c0_6, %c0_7, %c0_8] : memref<1x16x16xi32, #tpu.memory_space<vmem>>, vector<1x16x16xi32>
    %5 = vector.shape_cast %4 : vector<1x16x16xi32> to vector<16x16xi32>
    %cst = arith.constant dense<0.000000e+00> : vector<16x32xf32>
    %6 = tpu.matmul %0, %3, %cst {dimension_numbers = #tpu.dot_dimension_numbers<[1], [0], [0], [1], [0, 0, 1, 1], [], []>} : vector<16x8xf32>, vector<8x32xf32>, vector<16x32xf32> -> vector<16x32xf32>
    %cst_9 = arith.constant -1.000000e+30 : f32
    %7 = vector.broadcast %cst_9 : f32 to vector<16x16xf32>
    %cst_10 = arith.constant 0.000000e+00 : f32
    %8 = vector.broadcast %cst_10 : f32 to vector<16x16xf32>
    %cst_11 = arith.constant 0.000000e+00 : f32
    %9 = vector.broadcast %cst_11 : f32 to vector<16x16xf32>
    %10 = vector.extract_strided_slice %6 {offsets = [0, 0], sizes = [16, 8], strides = [1, 1]} : vector<16x32xf32> to vector<16x8xf32>
    %cst_12 = arith.constant dense<0.000000e+00> : vector<16x16xf32>
    %11 = tpu.matmul %10, %1, %cst_12 {dimension_numbers = #tpu.dot_dimension_numbers<[1], [0], [0], [1], [0, 0, 1, 1], [], []>} : vector<16x8xf32>, vector<8x16xf32>, vector<16x16xf32> -> vector<16x16xf32>
    %12 = arith.maximumf %7, %11 : vector<16x16xf32>
    %13 = arith.subf %7, %12 : vector<16x16xf32>
    %14 = math.exp %13 : vector<16x16xf32>
    %15 = arith.mulf %8, %14 : vector<16x16xf32>
    %16 = arith.subf %11, %12 : vector<16x16xf32>
    %17 = math.exp %16 : vector<16x16xf32>
    %18 = arith.addf %15, %17 : vector<16x16xf32>
    %c0_i32 = arith.constant 0 : i32
    %19 = vector.broadcast %c0_i32 : i32 to vector<16x16xi32>
    %20 = arith.cmpi eq, %5, %19 : vector<16x16xi32>
    %21 = arith.select %20, %11, %9 : vector<16x16xi1>, vector<16x16xf32>
    %22 = vector.extract_strided_slice %6 {offsets = [0, 8], sizes = [16, 8], strides = [1, 1]} : vector<16x32xf32> to vector<16x8xf32>
    %cst_13 = arith.constant dense<0.000000e+00> : vector<16x16xf32>
    %23 = tpu.matmul %22, %1, %cst_13 {dimension_numbers = #tpu.dot_dimension_numbers<[1], [0], [0], [1], [0, 0, 1, 1], [], []>} : vector<16x8xf32>, vector<8x16xf32>, vector<16x16xf32> -> vector<16x16xf32>
    %24 = arith.maximumf %12, %23 : vector<16x16xf32>
    %25 = arith.subf %12, %24 : vector<16x16xf32>
    %26 = math.exp %25 : vector<16x16xf32>
    %27 = arith.mulf %18, %26 : vector<16x16xf32>
    %28 = arith.subf %23, %24 : vector<16x16xf32>
    %29 = math.exp %28 : vector<16x16xf32>
    %30 = arith.addf %27, %29 : vector<16x16xf32>
    %c1_i32 = arith.constant 1 : i32
    %31 = vector.broadcast %c1_i32 : i32 to vector<16x16xi32>
    %32 = arith.cmpi eq, %5, %31 : vector<16x16xi32>
    %33 = arith.select %32, %23, %21 : vector<16x16xi1>, vector<16x16xf32>
    %34 = vector.extract_strided_slice %6 {offsets = [0, 16], sizes = [16, 8], strides = [1, 1]} : vector<16x32xf32> to vector<16x8xf32>
    %cst_14 = arith.constant dense<0.000000e+00> : vector<16x16xf32>
    %35 = tpu.matmul %34, %1, %cst_14 {dimension_numbers = #tpu.dot_dimension_numbers<[1], [0], [0], [1], [0, 0, 1, 1], [], []>} : vector<16x8xf32>, vector<8x16xf32>, vector<16x16xf32> -> vector<16x16xf32>
    %36 = arith.maximumf %24, %35 : vector<16x16xf32>
    %37 = arith.subf %24, %36 : vector<16x16xf32>
    %38 = math.exp %37 : vector<16x16xf32>
    %39 = arith.mulf %30, %38 : vector<16x16xf32>
    %40 = arith.subf %35, %36 : vector<16x16xf32>
    %41 = math.exp %40 : vector<16x16xf32>
    %42 = arith.addf %39, %41 : vector<16x16xf32>
    %c2_i32 = arith.constant 2 : i32
    %43 = vector.broadcast %c2_i32 : i32 to vector<16x16xi32>
    %44 = arith.cmpi eq, %5, %43 : vector<16x16xi32>
    %45 = arith.select %44, %35, %33 : vector<16x16xi1>, vector<16x16xf32>
    %46 = vector.extract_strided_slice %6 {offsets = [0, 24], sizes = [16, 8], strides = [1, 1]} : vector<16x32xf32> to vector<16x8xf32>
    %cst_15 = arith.constant dense<0.000000e+00> : vector<16x16xf32>
    %47 = tpu.matmul %46, %1, %cst_15 {dimension_numbers = #tpu.dot_dimension_numbers<[1], [0], [0], [1], [0, 0, 1, 1], [], []>} : vector<16x8xf32>, vector<8x16xf32>, vector<16x16xf32> -> vector<16x16xf32>
    %48 = arith.maximumf %36, %47 : vector<16x16xf32>
    %49 = arith.subf %36, %48 : vector<16x16xf32>
    %50 = math.exp %49 : vector<16x16xf32>
    %51 = arith.mulf %42, %50 : vector<16x16xf32>
    %52 = arith.subf %47, %48 : vector<16x16xf32>
    %53 = math.exp %52 : vector<16x16xf32>
    %54 = arith.addf %51, %53 : vector<16x16xf32>
    %c3_i32 = arith.constant 3 : i32
    %55 = vector.broadcast %c3_i32 : i32 to vector<16x16xi32>
    %56 = arith.cmpi eq, %5, %55 : vector<16x16xi32>
    %57 = arith.select %56, %47, %45 : vector<16x16xi1>, vector<16x16xf32>
    %c16_i32 = arith.constant 16 : i32
    %58 = arith.muli %arg1, %c16_i32 : i32
    %59 = tpu.iota {dimensions = array<i32: 0>} : vector<16x16xi32>
    %60 = vector.broadcast %58 : i32 to vector<16x16xi32>
    %61 = arith.addi %60, %59 : vector<16x16xi32>
    %c-1_i32 = arith.constant -1 : i32
    %62 = vector.broadcast %c-1_i32 : i32 to vector<16x16xi32>
    %63 = arith.cmpi ne, %5, %62 : vector<16x16xi32>
    %c16_i32_16 = arith.constant 16 : i32
    %64 = vector.broadcast %c16_i32_16 : i32 to vector<16x16xi32>
    %65 = arith.cmpi slt, %61, %64 : vector<16x16xi32>
    %66 = arith.andi %63, %65 : vector<16x16xi1>
    %67 = math.log %54 : vector<16x16xf32>
    %68 = arith.addf %67, %48 : vector<16x16xf32>
    %69 = arith.subf %68, %57 : vector<16x16xf32>
    %cst_17 = arith.constant 0.000000e+00 : f32
    %70 = vector.broadcast %cst_17 : f32 to vector<16x16xf32>
    %71 = arith.select %66, %69, %70 : vector<16x16xi1>, vector<16x16xf32>
    %72 = vector.shape_cast %71 : vector<16x16xf32> to vector<1x16x16xf32>
    %cst_18 = arith.constant dense<0.000000e+00> : vector<1xf32>
    %73 = vector.multi_reduction <add>, %72, %cst_18 [1, 2] : vector<1x16x16xf32> to vector<1xf32>
    %74 = vector.shape_cast %73 : vector<1xf32> to vector<1x1x1xf32>
    %75 = vector.extract %74[0, 0, 0] : f32 from vector<1x1x1xf32>
    %76 = arith.extui %66 : vector<16x16xi1> to vector<16x16xi32>
    %77 = arith.sitofp %76 : vector<16x16xi32> to vector<16x16xf32>
    %78 = vector.shape_cast %77 : vector<16x16xf32> to vector<1x16x16xf32>
    %cst_19 = arith.constant dense<0.000000e+00> : vector<1xf32>
    %79 = vector.multi_reduction <add>, %78, %cst_19 [1, 2] : vector<1x16x16xf32> to vector<1xf32>
    %80 = vector.shape_cast %79 : vector<1xf32> to vector<1x1x1xf32>
    %81 = vector.extract %80[0, 0, 0] : f32 from vector<1x1x1xf32>
    %82 = tpu.iota {dimensions = array<i32: 2>} : vector<1x1x128xi32>
    %c0_i32_20 = arith.constant 0 : i32
    %83 = vector.broadcast %c0_i32_20 : i32 to vector<1x1x128xi32>
    %84 = arith.cmpi eq, %82, %83 : vector<1x1x128xi32>
    %cst_21 = arith.constant 0.000000e+00 : f32
    %85 = vector.broadcast %75 : f32 to vector<1x1x128xf32>
    %86 = vector.broadcast %cst_21 : f32 to vector<1x1x128xf32>
    %87 = arith.select %84, %85, %86 : vector<1x1x128xi1>, vector<1x1x128xf32>
    %c1_i32_22 = arith.constant 1 : i32
    %88 = vector.broadcast %c1_i32_22 : i32 to vector<1x1x128xi32>
    %89 = arith.cmpi eq, %82, %88 : vector<1x1x128xi32>
    %cst_23 = arith.constant 0.000000e+00 : f32
    %90 = vector.broadcast %81 : f32 to vector<1x1x128xf32>
    %91 = vector.broadcast %cst_23 : f32 to vector<1x1x128xf32>
    %92 = arith.select %89, %90, %91 : vector<1x1x128xi1>, vector<1x1x128xf32>
    %93 = arith.addf %87, %92 : vector<1x1x128xf32>
    %c0_24 = arith.constant 0 : index
    %c0_25 = arith.constant 0 : index
    %c0_26 = arith.constant 0 : index
    %94 = vector.load %arg6[%c0_24, %c0_25, %c0_26] : memref<1x1x128xf32, #tpu.memory_space<vmem>>, vector<1x1x128xf32>
    tpu.vector_store %arg6[%c0_24, %c0_25, %c0_26], %93 {strides = array<i32>} : memref<1x1x128xf32, #tpu.memory_space<vmem>>, vector<1x1x128xf32>,
    return
  }
  func.func @transform_0(%arg0: i32, %arg1: i32) -> (i32, i32, i32) {
    %c0_i32 = arith.constant 0 : i32
    %c0_i32_0 = arith.constant 0 : i32
    %c0_i32_1 = arith.constant 0 : i32
    return %arg0, %c0_i32, %c0_i32_0 : i32, i32, i32
  }
  func.func @transform_1(%arg0: i32, %arg1: i32) -> (i32, i32) {
    %c0_i32 = arith.constant 0 : i32
    %c0_i32_0 = arith.constant 0 : i32
    return %arg1, %c0_i32 : i32, i32
  }
  func.func @transform_2(%arg0: i32, %arg1: i32) -> (i32, i32) {
    %c0_i32 = arith.constant 0 : i32
    %c0_i32_0 = arith.constant 0 : i32
    %c0_i32_1 = arith.constant 0 : i32
    return %c0_i32, %c0_i32_0 : i32, i32
  }
  func.func @transform_3(%arg0: i32, %arg1: i32) -> (i32, i32, i32) {
    %c0_i32 = arith.constant 0 : i32
    %c0_i32_0 = arith.constant 0 : i32
    return %arg0, %arg1, %c0_i32 : i32, i32, i32
  }
  func.func @transform_4(%arg0: i32, %arg1: i32) -> (i32, i32, i32) {
    %c1_i32 = arith.constant 1 : i32
    %0 = arith.muli %arg0, %c1_i32 : i32
    %1 = arith.addi %0, %arg1 : i32
    %c0_i32 = arith.constant 0 : i32
    %c0_i32_0 = arith.constant 0 : i32
    %c0_i32_1 = arith.constant 0 : i32
    return %1, %c0_i32, %c0_i32_0 : i32, i32, i32
  }
}

</mosaic_0001>

<bundles_post_ra>
// kernel: tpu_custom_call.1
= control target key start
LH: loop header
LB: loop body
LE: loop exit
PB: predicated region body
PF: predicated region fallthrough
CT: control target
= control target key end

     0   :  { %9 = vsyncpa [#allocation3], 0  ;;  %s1642_s0 = inlined_call_operand.hbm [shape: f32[2,8,32], index: 0, kind: input, shape index: {}]   ;;  %s1643_s1 = inlined_call_operand.vmem [shape: f32[16,8], index: 1, kind: input, shape index: {}]   ;;  %s1644_s2 = inlined_call_operand.hbm [shape: f32[8,16], index: 2, kind: input, shape index: {}]   ;;  %s1645_s3 = inlined_call_operand.vmem [shape: s32[2,16,16], index: 3, kind: input, shape index: {}]   ;;  %s1646_s4 = inlined_call_operand.hbm [shape: f32[2,1,128], index: 4, kind: output, shape index: {}]  }
   0x1   :  { %11 = vsyncpa [#allocation3 + $0x1], 0 }
   0x2   :  { %12 = vsyncpa [#allocation6], 0 }
   0x3   :  { %13 = vsyncpa [#allocation4], 0 }
   0x4   :  { %15 = vsyncpa [#allocation4 + $0x1], 0  ;;  %s1362_s15 = smov 0   ;;  %s1364_s16 = smov 0  }
   0x5   :  { %s1366_s17 = smov 0   ;;  %s1368_s18 = smov 0  }
   0x6   :  { %s1370_s19 = smov 0   ;;  %s1372_s20 = smov 0  }
   0x7 LB: > { %s998_s21 = sadd.s32 4294967295, %s1328_s20   ;;  %s999_s22 = sadd.s32 4294967294, %s1328_s20   ;;  %s1328_s20 = sphi %s1372_s20, %s21_s20   ;;  %s1324_s19 = sphi %s1370_s19, %s1671_s19   ;;  %s1320_s18 = sphi %s1368_s18, %s1670_s18   ;;  %s1316_s17 = sphi %s1366_s17, %s1669_s17   ;;  %s1312_s16 = sphi %s1364_s16, %s1668_s16   ;;  %s1308_s15 = sphi %s1362_s15, %s1667_s15  }
   0x8   : > { %p53_p0 = scmp.ne.s32.totalorder %s1312_s16, %s1308_s15  ;;  %p1396_p1 = scmp.eq.s32.totalorder %s998_s21, 0 }
   0x9   : > { %p1400_p2 = scmp.eq.s32.totalorder %s998_s21, 1  ;;  %p160_p3 = scmp.eq.s32.totalorder %s999_s22, 1 }
   0xa   : > { %s1651_s23 = scalar_select %p1396_p1, 1, 0 }
   0xb   : > { %s1652_s24 = scalar_select %p1400_p2, 1, 0 }
   0xc   : > { %p1406_p4 = por %p1396_p1, %p53_p0  ;;  %p1000_p5 = scmp.ge.s32.totalorder %s1328_s20, 1 }
   0xd   : > { %p1411_p6 = por %p160_p3, %p53_p0  ;;  %p167_p7 = scmp.lt.s32.totalorder %s1328_s20, 3 }
   0xe   : > { %s1653_s25 = scalar_select %p1406_p4, 1, 0 }
   0xf   : > { %s1654_s26 = scalar_select %p1411_p6, 1, 0 }
  0x10   : > { %p1416_p8 = pnand %p1000_p5, %p167_p7  ;;  %s1330_s28 = smov [#allocation5]  }
  0x11   : > { %s189_s29 = sshll.u32 %s1330_s28, 4  ;;  %s33_s5 = sadd.s32 1, %s1324_s19  ;;  %s190_s29 = int_to_ptr.vmem [resolvable:$true] %s189_s29 }
  0x12   : > { %s1655_s27 = scalar_select %p1416_p8, 1, 0 }
  0x13   : > { %p1079_p10 = pneg %p1416_p8  ;;  %s40_s6 = sadd.s32 1, %s1316_s17 }
  0x14   : > { %p1431_p12 = scmp.ge.s32.totalorder %s33_s5, 2  ;;  %s1184_s10 = scalar_lea.hbm %s1644_s2, 128 }
  0x15   : > { %p1425_p11 = pnand %p1079_p10, %p1396_p1  ;;  %p1185_p13 = scmp.ne.s32.totalorder %s1644_s2, %s1184_s10 }
  0x16   : > { %s1657_s7 = scalar_select %p1431_p12, 1, 0 }
  0x17   : > { %p1186_p0 = pneg %p1425_p11  ;;  %p1191_p7 = scmp.lt.u32.totalorder %s1184_s10, %s1644_s2 }
  0x19   : > { %p1187_p3 = pnand %p1186_p0, %p1185_p13 }
  0x1b   : > { %p1188_p5 = pneg %p1187_p3 }
  0x1d   : > { %p1193_p10 = pnand %p1191_p7, %p1188_p5 }
  0x1f   : > { %1196 = shalt.err (!%p1193_p10)
}
  0x20   : > { %s1197_s21 = scalar_lea.vmem %s190_s29, 128  ;;  %p1205_p4 = scmp.lt.s32.totalorder %s190_s29, %s190_s29 }
  0x21   : > { %p1198_p9 = scmp.ne.s32.totalorder %s190_s29, %s1197_s21  ;;  %p1206_p8 = scmp.lt.s32.totalorder %s1197_s21, %s1197_s21 }
  0x23   : > { %p1200_p6 = pnand %p1198_p9, %p1186_p0  ;;  %p1207_p2 = por %p1206_p8, %p1205_p4 }
  0x25   : > { %p1201_p1 = pneg %p1200_p6 }
  0x27   : > { %p1208_p12 = pnand %p1207_p2, %p1201_p1 }
  0x29   : > { %1211 = shalt.err (!%p1208_p12)
}
  0x2a   : > { %1082 = dma.hbm_to_vmem [thread:$0]  (!%p1425_p11), %s1644_s2, 128, %s190_s29, [#allocation6]  }
  0x2b   : > { %p1658_p4 = scmp.ne.s32.totalorder %s1657_s7, 0  ;;  %p47_p1 = scmp.ne.s32.totalorder %s1316_s17, %s1312_s16 }
  0x2c   : > { %p48_p2 = scmp.eq.s32.totalorder %s1328_s20, 0  ;;  %p1092_p6 = scmp.lt.s32.totalorder %s1328_s20, 2 }
  0x2d   : > { %s1673_s5 = smov (%p1658_p4, %s33_s5), 0  ;;  %p1659_p12 = scmp.ne.s32.totalorder %s1652_s24, 0 }
  0x2e   : > { %s37_s30 = ssub.s32 %s1324_s19, %s1673_s5  ;;  %p49_p9 = por %p48_p2, %p47_p1 }
  0x2f   : > { %p38_p8 = scmp.eq.s32.totalorder %s37_s30, 0  ;;  %p1463_p13 = por %p1659_p12, %p47_p1 }
  0x30   : > { %s200_s9 = sand.u32 1, %s1316_s17   ;;  %s1005_s7 = sshll.u32 %s1324_s19, 7 }
  0x31   : > { %s1471_s10 = scalar_select %p38_p8, %s1316_s17, %s40_s6  }
  0x32   : > { %s1004_s29 = sshll.u32 %s200_s9, 3  ;;  %s1477_s13 = scalar_lea.hbm %s1642_s0, %s1005_s7 }
  0x33   : > { %s204_s24 = scalar_lea.vmem [#allocation2], %s1004_s29  ;;  %p1481_p11 = pnand %p1092_p6, %p49_p9 }
  0x34   : > { %s211_s14 = sshll.u32 %s204_s24, 4  ;;  %s201_s6 = scalar_lea.sflag [#allocation3], %s200_s9  ;;  %s1479_s14 = int_to_ptr.vmem [resolvable:$true] %s211_s14 }
  0x35   : > { %s1212_s22 = scalar_lea.hbm %s1477_s13, 128  ;;  %p1214_p3 = pneg %p1481_p11 }
  0x36   : > { %p1213_p0 = scmp.ne.s32.totalorder %s1477_s13, %s1212_s22  ;;  %s1217_s29 = scalar_lea.hbm %s1642_s0, 256 }
  0x37   : > { %p1218_p10 = scmp.lt.u32.totalorder %s1477_s13, %s1642_s0  ;;  %p1219_p4 = scmp.lt.u32.totalorder %s1217_s29, %s1212_s22 }
  0x38   : > { %p1215_p5 = pnand %p1214_p3, %p1213_p0  ;;  %p1221_p2 = scmp.lt.u32.totalorder %s1212_s22, %s1477_s13 }
  0x39   : > { %p1220_p1 = por %p1219_p4, %p1218_p10 }
  0x3a   : > { %p1216_p7 = pneg %p1215_p5 }
  0x3b   : > { %p1222_p6 = por %p1221_p2, %p1220_p1 }
  0x3d   : > { %p1223_p8 = pnand %p1222_p6, %p1216_p7 }
  0x3f   : > { %1226 = shalt.err (!%p1223_p8)
}
  0x40   : > { %s1227_s9 = scalar_lea.vmem %s1479_s14, 128  ;;  %s1331_s12 = smov [#allocation2]  }
  0x41   : > { %p1228_p9 = scmp.ne.s32.totalorder %s1479_s14, %s1227_s9  ;;  %s1232_s24 = sshll.u32 %s1331_s12, 4  ;;  %s1233_s24 = int_to_ptr.vmem [resolvable:$false] %s1232_s24 }
  0x42   : > { %s1234_s28 = scalar_lea.vmem %s1233_s24, 256  ;;  %p1235_p5 = scmp.lt.s32.totalorder %s1479_s14, %s1233_s24 }
  0x43   : > { %p1230_p12 = pnand %p1228_p9, %p1214_p3  ;;  %p1236_p10 = scmp.lt.s32.totalorder %s1234_s28, %s1227_s9 }
  0x45   : > { %p1231_p0 = pneg %p1230_p12  ;;  %p1237_p4 = por %p1236_p10, %p1235_p5 }
  0x47   : > { %p1238_p1 = pnand %p1237_p4, %p1231_p0 }
  0x49   : > { %1241 = shalt.err (!%p1238_p1)
}
  0x4a   : > { %1086 = dma.hbm_to_vmem [thread:$0]  (!%p1481_p11), %s1477_s13, 128, %s1479_s14, %s201_s6  }
  0x4b   : > { %p1662_p7 = scmp.ne.s32.totalorder %s1655_s27, 0 }
  0x4c   : > { %s1513_s22 = sand.u32 (!%p1662_p7), 1, %s1312_s16   ;;  %p1663_p3 = scmp.ne.s32.totalorder (!%p1662_p7), %s1653_s25, 0 }
  0x4d   : > { %233 = sbr.rel (%p1662_p7) target bundleno = 912 (0x390), region = 36  ;;  %s1007_s30 = sshll.u32 (!%p1662_p7), %s1513_s22, 3 }
  0x4e   : > { %s236_s29 = scalar_lea.sflag (!%p1662_p7), [#allocation3], %s1513_s22  ;;  %s239_s7 = scalar_lea.vmem (!%p1662_p7), [#allocation2], %s1007_s30 }
  0x54   : > { %1295 = dma.done.wait (%p1663_p3), %s236_s29, 128  }
  0x55   : > { %1297 = vsyncadd (%p1663_p3), %s236_s29, 4294967168  ;;  %p1664_p2 = scmp.ne.s32.totalorder %s1651_s23, 0 }
  0x57   : > { %1299 = dma.done.wait (%p1664_p2), [#allocation6], 128  }
  0x58   : > { %1301 = vsyncadd (%p1664_p2), [#allocation6], 4294967168  ;;  %vm304_vm0 = vcmask 64512   ;;  %v301_v0 = vld [vmem:[%s239_s7] sm:$0xff]  ;;  %v300_v3 = vld [vmem:[#allocation5] sm:$0xff]  ;;  %s1332_s23 = smov 112  }
  0x59   : > { %v298_v1 = vld [vmem:[%s1643_s1] sm:$0xff]  ;;  %v299_v2 = vld [vmem:[%s1643_s1 + $0x8] sm:$0xff]  ;;  %1042 = vmatprep.subr.mxu0 %v301_v0  ;;  %1047 = vmatprep.subr.mxu1 %v300_v3  ;;  %s1333_s25 = smov 120   ;;  %s1334_s6 = smov 104   ;;  %vm827_vm3 = vcmask 130048   ;;  %v1335_v16 = vmov 0.0  }
  0x5a   : > { %1044 = vmatprep.mubr.msk.f32.mxu0 %vm304_vm0, %v298_v1  ;;  %1043 = vmatpush3.msra.mxu0 %v301_v0  ;;  %p288_p11 = scmp.lt.s32.totalorder %s1320_s18, 1  ;;  %s1023_s29 = sshll.u32 %s1320_s18, 4 }
  0x5b   : > { %1045 = vmatmul.mubr.msk.f32.vlgmr.msra.gmra.mrb[0].mxu0 %vm304_vm0, %v299_v2  ;;  %1052 = vmatprep.subr.mxu0 %v300_v3  ;;  %s280_s27 = scalar_lea.vmem [#allocation7], %s1513_s22 }
  0x5c   : > { %1048 = vmatpush3.msra.mxu1 %v300_v3  ;;  %1053 = vmatpush3.msra.mxu0 %v300_v3  ;;  %s289_s11 = scalar_select %p288_p11, %s1320_s18, 1 }
  0x5d   : > { %1057 = vmatprep.subr.mxu1 %v300_v3  ;;  %1062 = vmatprep.subr.mxu0 %v300_v3  ;;  %s880_s13 = sshll.u32 %s280_s27, 4  ;;  %s867_s18 = scalar_lea.sflag [#allocation4], %s1513_s22  ;;  %s1595_s13 = int_to_ptr.vmem [resolvable:$true] %s880_s13 }
  0x5e   : > { %s1026_s9 = sshll.u32 %s289_s11, 4 }
  0x5f   : > { %s295_s28 = scalar_lea.vmem %s1645_s3, %s1026_s9 }
  0x60   : > { %v1546_v14 = vld [vmem:[%s295_s28 + $0x8] sm:$0xff]  ;;  %v1548_v15 = vld [vmem:[%s295_s28] sm:$0xff] }
  0x61   : > { %vm811_vm1 = vcmp.ne.s32.totalorder %v1548_v15, 4294967295  ;;  %vm812_vm2 = vcmp.ne.s32.totalorder %v1546_v14, 4294967295  ;;  %vm486_vm4 = vcmp.eq.s32.totalorder %v1546_v14, 0  ;;  %vm485_vm5 = vcmp.eq.s32.totalorder %v1548_v15, 0 }
  0x62   : > { %v1021_v17 = vsel %vm811_vm1, 1.0, %v1335_v16  ;;  %v1022_v18 = vsel %vm812_vm2, 1.0, %v1335_v16  ;;  %vm591_vm6 = vcmp.eq.s32.totalorder %v1546_v14, 1  ;;  %vm696_vm7 = vcmp.eq.s32.totalorder %v1546_v14, 2 }
  0x63   : > { %v844_v19 = vsel %vm827_vm3, %v1021_v17, 0.0  ;;  %v845_v20 = vsel %vm827_vm3, %v1022_v18, 0.0  ;;  %vm590_vm8 = vcmp.eq.s32.totalorder %v1548_v15, 1  ;;  %vm695_vm9 = vcmp.eq.s32.totalorder %v1548_v15, 2 }
  0x64   : > { %v846_v21 = vadd.f32 %v845_v20, %v844_v19  ;;  %vm801_vm10 = vcmp.eq.s32.totalorder %v1546_v14, 3  ;;  %vm800_vm11 = vcmp.eq.s32.totalorder %v1548_v15, 3 }
 0x12e   : > { %v1046_v4 = vpop.f32.mrb[0].mxu0 }
 0x12f   : > { %v377_v5 = vpop.f32.mrb[1].mxu0 }
 0x130   : > { %594 = vrot.lane.b32.xlu1 %v377_v5, %s1332_s23  ;;  %489 = vrot.lane.b32.xlu0 %v377_v5, %s1333_s25 }
 0x131   : > { %1049 = vmatprep.mubr.msk.f32.mxu1 %vm304_vm0, %v377_v5 }
 0x132   : > { %1050 = vmatmul.mubr.msk.f32.vlgmr.msra.gmra.mrb[0].mxu1 %vm304_vm0, %v1046_v4 }
 0x133   : > { %1058 = vmatpush3.msra.mxu1 %v300_v3 }
 0x134   : > { %596 = vrot.lane.b32.xlu1 %v1046_v4, %s1332_s23  ;;  %491 = vrot.lane.b32.xlu0 %v1046_v4, %s1333_s25  ;;  %s1593_s23 = scalar_lea.hbm %s1646_s4, %s1023_s29  ;;  %s1242_s25 = scalar_lea.vmem %s1595_s13, 16 }
 0x135   : > { %p1243_p6 = scmp.ne.s32.totalorder %s1595_s13, %s1242_s25 }
 0x137   : > { %p1244_p8 = pnand %p1243_p6, %p1463_p13 }
 0x138   : > { %701 = vrot.lane.b32.xlu1 %v1046_v4, %s1334_s6  ;;  %699 = vrot.lane.b32.xlu0 %v377_v5, %s1334_s6  ;;  %s1336_s6 = smov [#allocation7]  }
 0x139   : > { %p1245_p9 = pneg %p1244_p8  ;;  %s1246_s11 = sshll.u32 %s1336_s6, 4  ;;  %s1247_s11 = int_to_ptr.vmem [resolvable:$false] %s1246_s11 }
 0x13a   : > { %s1248_s9 = scalar_lea.vmem %s1247_s11, 32  ;;  %p1249_p12 = scmp.lt.s32.totalorder %s1595_s13, %s1247_s11 }
 0x13b   : > { %p1250_p0 = scmp.lt.s32.totalorder %s1248_s9, %s1242_s25 }
 0x13d   : > { %p1251_p5 = por %p1250_p0, %p1249_p12 }
 0x13f   : > { %p1252_p10 = pnand %p1251_p5, %p1245_p9 }
 0x15c   : > { %847 = vadd.xlane.f32.xlu1 %v846_v21 }
 0x1a2   : > { %v595_v6 = vpop.permute.xlu1 %594  ;;  %v490_v7 = vpop.permute.xlu0 %489 }
 0x1a3   : > { %1054 = vmatprep.mubr.msk.f32.mxu0 %vm304_vm0, %v490_v7  ;;  %1059 = vmatprep.mubr.msk.f32.mxu1 %vm304_vm0, %v595_v6 }
 0x1a6   : > { %v597_v8 = vpop.permute.xlu1 %596  ;;  %v492_v9 = vpop.permute.xlu0 %491 }
 0x1a7   : > { %1055 = vmatmul.mubr.msk.f32.vlgmr.msra.gmra.mrb[2].mxu0 %vm304_vm0, %v492_v9  ;;  %1060 = vmatmul.mubr.msk.f32.vlgmr.msra.gmra.mrb[2].mxu1 %vm304_vm0, %v597_v8 }
 0x1a8   : > { %1063 = vmatpush3.msra.mxu0 %v300_v3 }
 0x1aa   : > { %v702_v10 = vpop.permute.xlu1 %701  ;;  %v700_v11 = vpop.permute.xlu0 %699 }
 0x1ab   : > { %1064 = vmatprep.mubr.msk.f32.mxu0 %vm304_vm0, %v700_v11 }
 0x1ac   : > { %1065 = vmatmul.mubr.msk.f32.vlgmr.msra.gmra.mrb[4].mxu0 %vm304_vm0, %v702_v10 }
 0x205   : > { %v1051_v12 = vpop.f32.mrb[0].mxu1 }
 0x206   : > { %v458_v13 = vpop.f32.mrb[1].mxu1  ;;  %v468_v22 = vmax.f32 %v1051_v12, -1e+30  ;;  %v488_v31 = vsel %vm486_vm4, %v1051_v12, 0.0 }
 0x207   : > { %v467_v23 = vmax.f32 %v458_v13, -1e+30  ;;  %v487_v35 = vsel %vm485_vm5, %v458_v13, 0.0 }
 0x208   : > { %v470_v24 = vsub.f32 -1e+30, %v468_v22  ;;  %v478_v27 = vsub.f32 %v1051_v12, %v468_v22 }
 0x209   : > { %v469_v25 = vsub.f32 -1e+30, %v467_v23  ;;  %v477_v28 = vsub.f32 %v458_v13, %v467_v23 }
 0x20a   : > { %v473_v26 = vmul.f32 1.442695, %v470_v24  ;;  %v481_v30 = vmul.f32 1.442695, %v478_v27 }
 0x20b   : > { %v471_v29 = vmul.f32 1.442695, %v469_v25  ;;  %v479_v34 = vmul.f32 1.442695, %v477_v28 }
 0x20c   : > { %1148 = vpow2.f32 %v473_v26 }
 0x20d   : > { %1150 = vpow2.f32 %v471_v29 }
 0x20e   : > { %1152 = vpow2.f32 %v481_v30 }
 0x216   : > { %v1149_v0 = vpop.eup %1148 }
 0x217   : > { %v1151_v8 = vpop.eup %1150  ;;  %v476_v9 = vmul.f32 0.0, %v1149_v0 }
 0x218   : > { %v1153_v13 = vpop.eup %1152  ;;  %v475_v18 = vmul.f32 0.0, %v1151_v8 }
 0x219   : > { %v484_v17 = vadd.f32 %v1153_v13, %v476_v9 }
 0x27a   : > { %v1056_v32 = vpop.f32.mrb[2].mxu0  ;;  %v1061_v33 = vpop.f32.mrb[2].mxu1 }
 0x27b   : > { %v573_v36 = vmax.f32 %v468_v22, %v1056_v32  ;;  %v593_v37 = vsel %vm591_vm6, %v1056_v32, %v488_v31  ;;  %v563_v38 = vpop.f32.mrb[3].mxu0  ;;  %v668_v39 = vpop.f32.mrb[3].mxu1 }
 0x27c   : > { %v698_v40 = vsel %vm696_vm7, %v1061_v33, %v593_v37  ;;  %v572_v41 = vmax.f32 %v467_v23, %v563_v38  ;;  %v592_v42 = vsel %vm590_vm8, %v563_v38, %v487_v35 }
 0x27d   : > { %v575_v43 = vsub.f32 %v468_v22, %v573_v36  ;;  %v583_v44 = vsub.f32 %v1056_v32, %v573_v36  ;;  %v678_v45 = vmax.f32 %v573_v36, %v1061_v33  ;;  %v697_v46 = vsel %vm695_vm9, %v668_v39, %v592_v42 }
 0x27e   : > { %v574_v47 = vsub.f32 %v467_v23, %v572_v41  ;;  %v582_v48 = vsub.f32 %v563_v38, %v572_v41  ;;  %v677_v49 = vmax.f32 %v572_v41, %v668_v39 }
 0x27f   : > { %v578_v50 = vmul.f32 1.442695, %v575_v43  ;;  %v586_v51 = vmul.f32 1.442695, %v583_v44  ;;  %v680_v52 = vsub.f32 %v573_v36, %v678_v45  ;;  %v688_v53 = vsub.f32 %v1061_v33, %v678_v45  ;;  %v1066_v54 = vpop.f32.mrb[4].mxu0 }
 0x280   : > { %v679_v55 = vsub.f32 %v572_v41, %v677_v49  ;;  %v687_v56 = vsub.f32 %v668_v39, %v677_v49  ;;  %v773_v57 = vpop.f32.mrb[5].mxu0  ;;  %v576_v59 = vmul.f32 1.442695, %v574_v47  ;;  %v1570_v60 = vmax.f32 %v678_v45, %v1066_v54 }
 0x281   : > { %1154 = vpow2.f32 %v578_v50  ;;  %v683_v58 = vmul.f32 1.442695, %v680_v52  ;;  %v691_v61 = vmul.f32 1.442695, %v688_v53  ;;  %v584_v62 = vmul.f32 1.442695, %v582_v48 }
 0x282   : > { %1156 = vpow2.f32 %v479_v34  ;;  %v1574_v63 = vsel %vm801_vm10, %v1066_v54, %v698_v40  ;;  %v785_v1 = vsub.f32 %v678_v45, %v1570_v60  ;;  %v793_v2 = vsub.f32 %v1066_v54, %v1570_v60 }
 0x283   : > { %1158 = vpow2.f32 %v586_v51  ;;  %v782_v3 = vmax.f32 %v677_v49, %v773_v57  ;;  %v681_v4 = vmul.f32 1.442695, %v679_v55  ;;  %v802_v5 = vsel %vm800_vm11, %v773_v57, %v697_v46 }
 0x284   : > { %1160 = vpow2.f32 %v683_v58  ;;  %v788_v6 = vmul.f32 1.442695, %v785_v1  ;;  %v689_v10 = vmul.f32 1.442695, %v687_v56  ;;  %v796_v12 = vmul.f32 1.442695, %v793_v2 }
 0x285   : > { %1162 = vpow2.f32 %v576_v59  ;;  %v784_v7 = vsub.f32 %v677_v49, %v782_v3  ;;  %v792_v11 = vsub.f32 %v773_v57, %v782_v3  ;;  %v848_v59 = vpop.xlane.xlu1 %847 }
 0x286   : > { %1164 = vpow2.f32 %v691_v61 }
 0x287   : > { %1166 = vpow2.f32 %v584_v62  ;;  %v786_v16 = vmul.f32 1.442695, %v784_v7  ;;  %v794_v20 = vmul.f32 1.442695, %v792_v11  ;;  %v856_v7 = vlaneseq }
 0x288   : > { %1168 = vpow2.f32 %v681_v4 }
 0x289   : > { %1170 = vpow2.f32 %v788_v6  ;;  %v857_v8 = vand.u32 127, %v856_v7 }
 0x28a   : > { %1172 = vpow2.f32 %v689_v10 }
 0x28b   : > { %v1155_v19 = vpop.eup %1154  ;;  %1174 = vpow2.f32 %v796_v12  ;;  %vm858_vm12 = vcmp.eq.s32.totalorder %v857_v8, 0  ;;  %vm861_vm13 = vcmp.eq.s32.totalorder %v857_v8, 1 }
 0x28c   : > { %v1157_v21 = vpop.eup %1156  ;;  %v581_v22 = vmul.f32 %v1155_v19, %v484_v17  ;;  %1176 = vpow2.f32 %v786_v16 }
 0x28d   : > { %v1159_v23 = vpop.eup %1158  ;;  %v483_v25 = vadd.f32 %v1157_v21, %v475_v18  ;;  %1178 = vpow2.f32 %v794_v20 }
 0x28e   : > { %v1161_v24 = vpop.eup %1160  ;;  %v589_v26 = vadd.f32 %v1159_v23, %v581_v22 }
 0x28f   : > { %v1163_v27 = vpop.eup %1162 }
 0x290   : > { %v1165_v28 = vpop.eup %1164  ;;  %v686_v29 = vmul.f32 %v1161_v24, %v589_v26  ;;  %v580_v30 = vmul.f32 %v1163_v27, %v483_v25 }
 0x291   : > { %v1167_v31 = vpop.eup %1166 }
 0x292   : > { %v1169_v32 = vpop.eup %1168  ;;  %v694_v33 = vadd.f32 %v1165_v28, %v686_v29  ;;  %v588_v34 = vadd.f32 %v1167_v31, %v580_v30 }
 0x293   : > { %v1171_v35 = vpop.eup %1170 }
 0x294   : > { %v1173_v36 = vpop.eup %1172  ;;  %v685_v37 = vmul.f32 %v1169_v32, %v588_v34  ;;  %v791_v38 = vmul.f32 %v1171_v35, %v694_v33 }
 0x295   : > { %v1175_v39 = vpop.eup %1174 }
 0x296   : > { %v693_v40 = vadd.f32 %v1173_v36, %v685_v37  ;;  %v799_v41 = vadd.f32 %v1175_v39, %v791_v38  ;;  %v1177_v42 = vpop.eup %1176 }
 0x297   : > { %v1179_v44 = vpop.eup %1178 }
 0x298   : > { %1180 = vlog2.f32 %v799_v41  ;;  %v790_v43 = vmul.f32 %v1177_v42, %v693_v40 }
 0x29a   : > { %v798_v45 = vadd.f32 %v1179_v44, %v790_v43 }
 0x29c   : > { %1182 = vlog2.f32 %v798_v45 }
 0x2a2   : > { %v1181_v46 = vpop.eup %1180 }
 0x2a3   : > { %v820_v47 = vmul.f32 0.6931472, %v1181_v46 }
 0x2a5   : > { %v822_v48 = vadd.f32 %v820_v47, %v1570_v60  ;;  %v849_v60 = vrot.slane %v848_v59, 4 }
 0x2a6   : > { %v1183_v49 = vpop.eup %1182 }
 0x2a7   : > { %v824_v50 = vsub.f32 %v822_v48, %v1574_v63  ;;  %v818_v51 = vmul.f32 0.6931472, %v1183_v49  ;;  %v850_v61 = vadd.f32 %v849_v60, %v848_v59 }
 0x2a9   : > { %v821_v52 = vadd.f32 %v818_v51, %v782_v3  ;;  %v826_v53 = vsel %vm812_vm2, %v824_v50, 0.0  ;;  %v851_v62 = vrot.slane %v850_v61, 2 }
 0x2aa   : > { %v829_v55 = vsel %vm827_vm3, %v826_v53, 0.0 }
 0x2ab   : > { %v823_v54 = vsub.f32 %v821_v52, %v802_v5  ;;  %v852_v14 = vadd.f32 %v851_v62, %v850_v61 }
 0x2ad   : > { %v825_v56 = vsel %vm811_vm1, %v823_v54, 0.0  ;;  %v853_v4 = vrot.slane %v852_v14, 1 }
 0x2ae   : > { %v828_v57 = vsel %vm827_vm3, %v825_v56, 0.0 }
 0x2af   : > { %v830_v58 = vadd.f32 %v829_v55, %v828_v57  ;;  %v854_v6 = vadd.f32 %v853_v4, %v852_v14 }
 0x2b1   : > { %831 = vadd.xlane.f32.xlu0 %v830_v58 }
 0x33e   : > { %v832_v63 = vpop.xlane.xlu0 %831 }
 0x33f   : > { %v833_v0 = vrot.slane %v832_v63, 4 }
 0x341   : > { %v834_v1 = vadd.f32 %v833_v0, %v832_v63 }
 0x343   : > { %v835_v2 = vrot.slane %v834_v1, 2 }
 0x345   : > { %v836_v3 = vadd.f32 %v835_v2, %v834_v1 }
 0x347   : > { %v837_v5 = vrot.slane %v836_v3, 1 }
 0x349   : > { %v838_v15 = vadd.f32 %v837_v5, %v836_v3 }
 0x34b   : > { %1067 = vpush %v838_v15 }
 0x34c   : > { %1069 = vpush %v854_v6 }
 0x37c   : > { %s1068_s30 = spop %1067 }
 0x37d   : > { %v859_v9 = vstv %s1068_s30  ;;  %s1070_s7 = spop %1069 }
 0x37e   : > { %v860_v10 = vsel %vm858_vm12, %v859_v9, 0.0  ;;  %v862_v11 = vstv %s1070_s7 }
 0x37f   : > { %v863_v12 = vsel %vm861_vm13, %v862_v11, 0.0 }
 0x380   : > { %v864_v13 = vadd.f32 %v863_v12, %v860_v10 }
 0x382   : > { %865 = vst [vmem:[%s280_s27] sm:$0x1] %v864_v13 }
 0x383   : > { %1255 = shalt.err (!%p1252_p10)
}
 0x384   : > { %s1256_s22 = scalar_lea.hbm %s1593_s23, 16  ;;  %s1260_s28 = scalar_lea.hbm %s1646_s4, 32 }
 0x385   : > { %p1257_p4 = scmp.ne.s32.totalorder %s1593_s23, %s1256_s22  ;;  %p1261_p3 = scmp.lt.u32.totalorder %s1593_s23, %s1646_s4 }
 0x386   : > { %p1262_p2 = scmp.lt.u32.totalorder %s1260_s28, %s1256_s22  ;;  %p1264_p6 = scmp.lt.u32.totalorder %s1256_s22, %s1593_s23 }
 0x387   : > { %p1258_p1 = pnand %p1257_p4, %p1463_p13 }
 0x388   : > { %p1263_p11 = por %p1262_p2, %p1261_p3 }
 0x389   : > { %p1259_p7 = pneg %p1258_p1 }
 0x38a   : > { %p1265_p8 = por %p1264_p6, %p1263_p11 }
 0x38c   : > { %p1266_p9 = pnand %p1265_p8, %p1259_p7 }
 0x38e   : > { %1269 = shalt.err (!%p1266_p9)
}
 0x38f   : > { %1077 = dma.vmem_to_hbm [thread:$0]  (%p1463_p13), %s1595_s13, 16, %s1593_s23, %s867_s18  }
 0x390 PF: > { %s892_s7 = sand.u32 1, %s1308_s15   ;;  %p1665_p12 = scmp.ne.s32.totalorder %s1654_s26, 0 }
 0x391   : > { %p1666_p0 = scmp.ge.s32.totalorder %s1328_s20, 2  ;;  %s893_s27 = scalar_lea.sflag [#allocation4], %s892_s7 }
 0x393   : > { %p1088_p5 = pnand %p1666_p0, %p1665_p12 }
 0x395   : > { %1303 = dma.done.wait (!%p1088_p5), %s893_s27, 16  }
 0x396   : > { %1305 = vsyncadd (!%p1088_p5), %s893_s27, 4294967280  ;;  %s21_s20 = sadd.s32 1, %s1328_s20   ;;  %s1667_s15 = smov %s1312_s16 }
 0x397   : > { %p18_p10 = scmp.ge.s32.totalorder %s21_s20, 4   ;;  %s1668_s16 = smov %s1316_s17 }
 0x398   : > { %s1669_s17 = smov %s1471_s10  ;;  %s1670_s18 = smov %s1324_s19 }
 0x399   : > { %s1671_s19 = smov %s1673_s5  ;;  %20 = sbr.rel (!%p18_p10) target bundleno = 7 (0x7), region = 91 }
 0x3a0   :  { %897 = vsyncpa [#allocation3], 1 }
 0x3a1   :  { %899 = vsyncpa [#allocation3 + $0x1], 1 }
 0x3a2   :  { %900 = vsyncpa [#allocation6], 1 }
 0x3a3   :  { %901 = vsyncpa [#allocation4], 1 }
 0x3a4   :  { %903 = vsyncpa [#allocation4 + $0x1], 1 }

</bundles_post_ra>
